<compile_context>
chip_gen: v7x
topology: tpu7x:2x2x1
jax: 0.10.0
libtpu: 0.0.40
codegen_flags: <defaults>
</compile_context>

<pallas_src>
import numpy as np
from types import SimpleNamespace

import jax
import jax.numpy as jnp
from jax.experimental import pallas as pl
from jax.experimental.pallas import tpu as pltpu


# ----------------------------------------------------------------------------- helpers
def next_power2(x):
    return 1 << (int(x) - 1).bit_length()


def _round_up(x, m):
    return ((x + m - 1) // m) * m


def _cdiv(a, b):
    return -(-a // b)


def _vmem_capacity_bytes():
    # Trace-time hardware query; fall back to the smallest per-TC VMEM (v7x: 64 MiB).
    try:
        return int(pltpu.get_tpu_info().vmem_capacity_bytes)
    except Exception:
        return 64 << 20


def get_hyper_mask(H, W, compress_rate, val=0.0, interpolate="const", onesided=True):
    """Deterministic hyperbolic band mask for a onesided (H, W) spectrum.

    Keeps the (1 - compress_rate/100) fraction of coefficients with the smallest
    hyperbolic frequency index (1+r_u)*(1+r_v); everything else is set to `val`.
    Returns (mask[H, W, 2], None) to mirror the original helper's signature.
    """
    # TODO(synk): exact get_hyper_mask source (and non-"const" interpolation modes)
    # from the original repo is unavailable; this is a faithful const-interpolation
    # hyperbolic approximation.
    u = np.arange(H)
    ru = np.minimum(u, H - u).astype(np.float64)          # wrapped vertical frequency
    v = np.arange(W).astype(np.float64)                    # onesided horizontal frequency
    dist = (ru[:, None] + 1.0) * (v[None, :] + 1.0)        # hyperbola x*y = const
    total = H * W
    keep = int(round(total * (1.0 - float(compress_rate) / 100.0)))
    order = np.argsort(dist.ravel(), kind="stable")
    flat = np.full(total, float(val), dtype=np.float32)
    flat[order[:keep]] = 1.0
    mask2d = flat.reshape(H, W)
    mask = np.stack([mask2d, mask2d], axis=-1)             # (H, W, 2): same for re & im
    return mask, None


def _hermitian_weights(W_fft, Wo):
    """Doubling weights that fold the onesided hermitian reconstruction into a real sum."""
    wv = np.full((Wo,), 2.0, dtype=np.float64)
    wv[0] = 1.0
    if W_fft % 2 == 0:
        wv[Wo - 1] = 1.0
    return wv


def _build_fused_operator(H_fft, W_fft, mask_real):
    """Real (H*W, H*W) operator: out_flat = x_flat @ Op  <=>  irfft2(mask * rfft2(x)).

    Op[h*W+w, h'*W+w'] = (1/(HW)) Re{ sum_{u,v} wv[v] M[u,v]
                                      e^{-2pi i u (h-h')/H} e^{-2pi i v (w-w')/W} }
    """
    Wo = W_fft // 2 + 1
    wv = _hermitian_weights(W_fft, Wo)
    Eh = np.exp(-2j * np.pi * np.outer(np.arange(H_fft), np.arange(H_fft)) / H_fft)  # (H, H)
    Ew = np.exp(-2j * np.pi * np.outer(np.arange(Wo), np.arange(W_fft)) / W_fft)     # (Wo, W)
    Mw = mask_real.astype(np.float64) * wv[None, :]                                   # (H, Wo)
    # S[u, w, w'] = sum_v Mw[u, v] e^{-2pi i v (w - w')/W}
    S = np.einsum("uv,vw,vx->uwx", Mw, Ew, np.conj(Ew), optimize=True)
    # K[h, w, h', w'] = Re{ sum_u e^{-2pi i u (h - h')/H} S[u, w, w'] } / (H*W)
    K = np.einsum("uh,uk,uwx->hwkx", Eh, np.conj(Eh), S, optimize=True).real
    K /= float(H_fft * W_fft)
    HW = H_fft * W_fft
    return np.ascontiguousarray(K.reshape(HW, HW)).astype(np.float32)


# ----------------------------------------------------------------------------- kernels
def _fused_kernel(x_ref, op_ref, o_ref):
    # One lane-dense MXU matmul per grid step: (TB, HWp) @ (HWp, HWp), f32 accumulate.
    # NOTE: default f32 matmul precision matched the jnp.fft reference at 2e-3 on TPU;
    # precision is left at the default that was validated in the sandbox run.
    o_ref[...] = jnp.dot(x_ref[...], op_ref[...], preferred_element_type=jnp.float32)


def _sep_kernel(x_ref, r1_ref, r1s_ref, ch_ref, sh_ref, mw_ref, r2_ref, o_ref):
    """Batched separable DFT path.

    Data layout: real/imag parts are concatenated along lanes (width 2*Wp, a multiple
    of 128), so every matmul is a 128+-lane batched contraction (flash-attention-style
    'bqk,bkd->bqd' pattern).  All sign/permutation bookkeeping is folded into the
    host-side operands (r1, r1s, r2) so the kernel is matmuls + one masked multiply.
    """
    f32 = jnp.float32
    x = x_ref[...]                                  # (TB, H, W) real images
    TB, H, W = x.shape
    C2 = r1_ref.shape[1]                            # 2 * Wp (multiple of 128)

    r1b = pl.broadcast_to(r1_ref[...], (TB, W, C2))
    r1sb = pl.broadcast_to(r1s_ref[...], (TB, W, C2))
    chb = pl.broadcast_to(ch_ref[...], (TB, H, H))
    shb = pl.broadcast_to(sh_ref[...], (TB, H, H))
    mwb = pl.broadcast_to(mw_ref[...], (TB, H, C2))
    r2b = pl.broadcast_to(r2_ref[...], (TB, C2, W))

    # W-stage (onesided rfft along W):  a = [Ar | Ai],  asw = [Ai | -Ar]
    a = jnp.einsum('bhw,bwc->bhc', x, r1b, preferred_element_type=f32)
    asw = jnp.einsum('bhw,bwc->bhc', x, r1sb, preferred_element_type=f32)

    # H-stage (full fft along H):  xc = [Xr | Xi],  xcs = [-Xi | Xr]
    t1 = jnp.einsum('bhu,buc->bhc', chb, a, preferred_element_type=f32)
    t2 = jnp.einsum('bhu,buc->bhc', shb, asw, preferred_element_type=f32)
    t3 = jnp.einsum('bhu,buc->bhc', shb, a, preferred_element_type=f32)
    t4 = jnp.einsum('bhu,buc->bhc', chb, asw, preferred_element_type=f32)

    # complex mask (real mask, hermitian weights and 1/(H*W) folded in)
    e = (t1 + t2) * mwb                             # [Er | Ei]
    esw = (t3 - t4) * mwb                           # [-Ei | Er]

    # inverse H-stage:  pq = [Pr | Qr]
    pq = (jnp.einsum('bhu,buc->bhc', chb, e, preferred_element_type=f32)
          + jnp.einsum('bhu,buc->bhc', shb, esw, preferred_element_type=f32))

    # inverse W-stage: out = Pr @ Cw - Qr @ Sw  (signs/zero-padding folded into r2)
    # TODO(synk): for W < 128 this store is a masked partial vst; a lane-dense
    # (TB, H*W) output slab would need an in-kernel minor-dim reshape (relayout).
    o_ref[...] = jnp.einsum('bhc,bcw->bhw', pq, r2b, preferred_element_type=f32)


# ----------------------------------------------------------------------------- paths
def _fused_path(xb, mask_real, H_fft, W_fft, compute_dtype, limit_cap, block_budget):
    """Batched fused-operator path: out_flat = x_flat @ Op (one MXU matmul per step)."""
    B = xb.shape[0]
    HW = H_fft * W_fft
    HWp = _round_up(HW, 128)                        # keep blocks lane-dense for any H
    in_item = jnp.dtype(compute_dtype).itemsize
    align = 8 if in_item >= 4 else 16               # sublane (f32) / packed-sublane (bf16)

    op = _build_fused_operator(H_fft, W_fft, mask_real)
    if HWp != HW:
        op_p = np.zeros((HWp, HWp), dtype=np.float32)
        op_p[:HW, :HW] = op
        op = op_p

    # --- batch tile selection (VMEM-budgeted, low padding waste, >=2 steps if possible)
    op_bytes = 2 * HWp * HWp * in_item              # operator (conservatively 2 buffers)
    row_bytes = HWp * (in_item + 4)                 # one input row + one f32 output row
    tb_max = (block_budget - op_bytes) // (2 * row_bytes)
    tb_max = int(max(align, min(1024, (tb_max // align) * align)))

    B8 = _round_up(B, align)
    min_steps = _cdiv(B8, tb_max)
    pref_steps = 2 if B8 >= 2 * align else 1        # >=2 steps feeds both v7x TCs
    steps = max(min_steps, pref_steps)
    steps = max(1, min(steps, B8 // align))         # keep >= `align` real-ish rows/step
    TB = min(tb_max, _round_up(_cdiv(B8, steps), align))
    grid = _cdiv(B8, TB)
    B_pad = grid * TB

    xf = xb.reshape(B, HW)
    if xf.dtype != compute_dtype:
        xf = xf.astype(compute_dtype)
    if (B_pad != B) or (HWp != HW):                 # skip the copy when already aligned
        xf = jnp.pad(xf, ((0, B_pad - B), (0, HWp - HW)))

    # Needed-based VMEM limit, capped generation-aware (48 MiB on 64-MiB parts,
    # up to 96 MiB on 128-MiB parts).  NOTE: the operator block index never changes,
    # so Mosaic issues its DMA once; pipeline_mode=pl.Buffered(1) could also free the
    # second (dead) buffer, but is skipped here for lowering portability.
    needed = op_bytes + 2 * TB * HWp * in_item + 2 * TB * HWp * 4
    vmem_limit = int(min(needed + (16 << 20), limit_cap))

    out = pl.pallas_call(
        _fused_kernel,
        out_shape=jax.ShapeDtypeStruct((B_pad, HWp), jnp.float32),
        grid_spec=pltpu.PrefetchScalarGridSpec(
            num_scalar_prefetch=0,
            grid=(grid,),
            in_specs=[
                pl.BlockSpec((TB, HWp), lambda b: (b, 0)),
                pl.BlockSpec((HWp, HWp), lambda b: (0, 0)),
            ],
            out_specs=pl.BlockSpec((TB, HWp), lambda b: (b, 0)),
        ),
        compiler_params=pltpu.CompilerParams(
            dimension_semantics=("parallel",),
            vmem_limit_bytes=vmem_limit,
        ),
    )(xf, jnp.asarray(op, dtype=compute_dtype))
    return out[:B, :HW].reshape(B, H_fft, W_fft)


def _separable_path(xb, mask_real, H_fft, W_fft, limit_cap):
    """Fallback for large transforms (fused operator would not fit VMEM)."""
    B = xb.shape[0]
    H, W = H_fft, W_fft
    Wo = W // 2 + 1
    Wp = _round_up(Wo, 64)                          # 2*Wp is a multiple of 128 lanes
    C2 = 2 * Wp

    ang_h = 2.0 * np.pi * np.outer(np.arange(H), np.arange(H)) / H
    ch = np.cos(ang_h).astype(np.float32)           # (H, H), symmetric
    sh = np.sin(ang_h).astype(np.float32)
    ang_w = 2.0 * np.pi * np.outer(np.arange(W), np.arange(Wo)) / W
    cwt = np.cos(ang_w).astype(np.float32)           # (W, Wo)
    swt = np.sin(ang_w).astype(np.float32)

    # lane-concatenated operands (real | imag), zero padded to 2*Wp lanes
    r1 = np.zeros((W, C2), dtype=np.float32)         # x @ r1  = [Ar | Ai]
    r1[:, :Wo] = cwt
    r1[:, Wp:Wp + Wo] = -swt
    r1s = np.zeros((W, C2), dtype=np.float32)        # x @ r1s = [Ai | -Ar]
    r1s[:, :Wo] = -swt
    r1s[:, Wp:Wp + Wo] = -cwt
    r2 = np.zeros((C2, W), dtype=np.float32)         # [Pr | Qr] @ r2 = Pr@Cw - Qr@Sw
    r2[:Wo, :] = cwt.T
    r2[Wp:Wp + Wo, :] = -swt.T

    wv = _hermitian_weights(W, Wo)
    mw = (mask_real.astype(np.float64) * wv[None, :] / float(H * W)).astype(np.float32)
    mwc = np.zeros((H, C2), dtype=np.float32)        # mask replicated on both halves
    mwc[:, :Wo] = mw
    mwc[:, Wp:Wp + Wo] = mw

    # batch several images per grid step (amortize grid overhead, fill the MXU M dim)
    per_img = 4 * H * (4 * W + 12 * C2 + 2 * H)      # rough live-bytes estimate / image
    TB = int(max(1, min(8, (24 << 20) // max(per_img, 1))))
    B_pad = _round_up(B, TB)
    x = xb.astype(jnp.float32)
    if B_pad != B:
        x = jnp.pad(x, ((0, B_pad - B), (0, 0), (0, 0)))
    vmem_limit = int(min(TB * per_img + (32 << 20), limit_cap))

    out = pl.pallas_call(
        _sep_kernel,
        out_shape=jax.ShapeDtypeStruct((B_pad, H, W), jnp.float32),
        grid_spec=pltpu.PrefetchScalarGridSpec(
            num_scalar_prefetch=0,
            grid=(B_pad // TB,),
            in_specs=[
                pl.BlockSpec((TB, H, W), lambda b: (b, 0, 0)),
                pl.BlockSpec((W, C2), lambda b: (0, 0)),
                pl.BlockSpec((W, C2), lambda b: (0, 0)),
                pl.BlockSpec((H, H), lambda b: (0, 0)),
                pl.BlockSpec((H, H), lambda b: (0, 0)),
                pl.BlockSpec((H, C2), lambda b: (0, 0)),
                pl.BlockSpec((C2, W), lambda b: (0, 0)),
            ],
            out_specs=pl.BlockSpec((TB, H, W), lambda b: (b, 0, 0)),
        ),
        compiler_params=pltpu.CompilerParams(
            dimension_semantics=("parallel",),
            vmem_limit_bytes=vmem_limit,
        ),
    )(x, jnp.asarray(r1), jnp.asarray(r1s), jnp.asarray(ch), jnp.asarray(sh),
      jnp.asarray(mwc), jnp.asarray(r2))
    return out[:B]


# ----------------------------------------------------------------------------- wrapper
def fft_band_2d_complex_mask(x, args, val=0.0, onesided=True, compute_dtype=jnp.float32):
    """Forward pass of FFTBand2DcomplexMask.

    compute_dtype: dtype for the fused-path matmul operands (x and operator).
      Default float32 (matches the FFT reference within 2e-3); bfloat16 roughly
      halves input/operator HBM bytes on the memory-bound fused path at the cost of
      ~1e-2-level absolute error (validated at 2e-2 tolerance in __main__).
    """
    N, C, H, W = x.shape
    if H != W:
        raise ValueError("We support only squared input.")
    if not onesided:
        raise NotImplementedError("onesided=False is not supported")
    # TODO(synk): args.is_DC_shift only affects the cached backward state in the
    # original module, not the forward output; it is ignored here.
    if args.next_power2:
        H_fft, W_fft = next_power2(H), next_power2(W)
        x_pad = jnp.pad(x, ((0, 0), (0, 0), (0, H_fft - H), (0, W_fft - W)))
    else:
        H_fft, W_fft = H, W
        x_pad = x

    Wo = W_fft // 2 + 1
    mask, _ = get_hyper_mask(H=H_fft, W=Wo, compress_rate=args.compress_fft_layer,
                             val=val, interpolate=args.interpolate, onesided=onesided)
    mask = mask[:, 0:Wo, :]
    mask_real = mask[..., 0]                        # same value for re & im parts

    B = N * C
    xb = x_pad.reshape(B, H_fft, W_fft)

    # Generation-aware VMEM caps: ~48 MiB on 64-MiB-VMEM parts (v7x), up to 96 MiB on
    # 128-MiB parts (v5e/v6e) -- this also makes the fused/separable threshold adaptive.
    vmem_cap = _vmem_capacity_bytes()
    limit_cap = int(min(max(vmem_cap - (16 << 20), 32 << 20), 96 << 20))
    block_budget = limit_cap - (16 << 20)

    HW = H_fft * W_fft
    HWp = _round_up(HW, 128)
    ib = jnp.dtype(compute_dtype).itemsize
    fused_ok = (2 * HWp * HWp * ib + 2 * 16 * HWp * (ib + 4)) <= block_budget

    # NOTE: for tiny single-tile workloads a plain XLA matmul would match the Pallas
    # path; we always run the Pallas kernel here so the kernel path stays exercised.
    if fused_ok:
        out_b = _fused_path(xb, mask_real, H_fft, W_fft, compute_dtype,
                            limit_cap, block_budget)
    else:
        out_b = _separable_path(xb, mask_real, H_fft, W_fft, limit_cap)

    out = out_b.reshape(N, C, H_fft, W_fft)[..., :H, :W]
    return out


# ----------------------------------------------------------------------------- reference
def reference_fft_band(x, args, val=0.0, onesided=True):
    """Pure-JAX reference using jnp.fft (same math torch.rfft/irfft implement)."""
    N, C, H, W = x.shape
    if args.next_power2:
        H_fft, W_fft = next_power2(H), next_power2(W)
        x_pad = jnp.pad(x, ((0, 0), (0, 0), (0, H_fft - H), (0, W_fft - W)))
    else:
        H_fft, W_fft = H, W
        x_pad = x
    Wo = W_fft // 2 + 1
    xfft = jnp.fft.rfft2(x_pad.astype(jnp.float32), axes=(-2, -1))
    mask, _ = get_hyper_mask(H=H_fft, W=Wo, compress_rate=args.compress_fft_layer,
                             val=val, interpolate=args.interpolate, onesided=onesided)
    m = jnp.asarray(mask[:, 0:Wo, 0])
    xfft = xfft * m
    out = jnp.fft.irfft2(xfft, s=(H_fft, W_fft), axes=(-2, -1))
    return out[..., :H, :W].astype(jnp.float32)


# ----------------------------------------------------------------------------- main
if __name__ == "__main__":
    args = SimpleNamespace(
        compress_fft_layer=50,   # percent of FFT coefficients removed
        interpolate="const",
        next_power2=False,
        is_DC_shift=False,       # only affects the cached backward state, not the output
    )

    # 1) Primary check: fused path, default f32 compute, module-sized input.
    x = jax.random.normal(jax.random.PRNGKey(0), (2, 4, 16, 16), dtype=jnp.float32)
    out = jax.block_until_ready(fft_band_2d_complex_mask(x, args, val=0.0, onesided=True))
    ref = jax.block_until_ready(reference_fft_band(x, args, val=0.0, onesided=True))
    assert out.shape == x.shape and out.dtype == jnp.float32
    if not np.allclose(np.asarray(out), np.asarray(ref), atol=2e-3, rtol=2e-3):
        raise AssertionError("fused f32 path does not match FFT reference")

    # 2) Bandwidth-optimized fused path (bf16 x / operator, f32 accumulate & output).
    out_bf16 = jax.block_until_ready(
        fft_band_2d_complex_mask(x, args, val=0.0, onesided=True,
                                 compute_dtype=jnp.bfloat16))
    assert out_bf16.shape == x.shape and out_bf16.dtype == jnp.float32
    if not np.allclose(np.asarray(out_bf16), np.asarray(ref), atol=2e-2, rtol=2e-2):
        raise AssertionError("fused bf16 path does not match FFT reference")

    # 3) Separable fallback path (large transform that does not fit the fused operator).
    x2 = jax.random.normal(jax.random.PRNGKey(1), (1, 2, 64, 64), dtype=jnp.float32)
    out2 = jax.block_until_ready(fft_band_2d_complex_mask(x2, args, val=0.0, onesided=True))
    ref2 = jax.block_until_ready(reference_fft_band(x2, args, val=0.0, onesided=True))
    assert out2.shape == x2.shape and out2.dtype == jnp.float32
    if not np.allclose(np.asarray(out2), np.asarray(ref2), atol=2e-3, rtol=2e-3):
        raise AssertionError("separable path does not match FFT reference")

    print("KERNEL_OK")
</pallas_src>

<mosaic_0001>
module attributes {stable_mosaic.version = 11 : i64} {
  func.func @_fused_kernel(%arg0: i32, %arg1: memref<8x256xf32, #tpu.memory_space<vmem>>, %arg2: memref<256x256xf32, #tpu.memory_space<vmem>>, %arg3: memref<8x256xf32, #tpu.memory_space<vmem>>) attributes {dimension_semantics = [#tpu.dimension_semantics<parallel>], iteration_bounds = array<i64: 1>, scalar_prefetch = 0 : i64, scratch_operands = 0 : i64, tpu.core_type = #tpu.core_type<tc>, window_params = [{transform_indices = @transform_0, window_bounds = array<i64: 8, 256>}, {pipeline_mode = #tpu.pipeline_mode<synchronous>, transform_indices = @transform_1, window_bounds = array<i64: 256, 256>}, {transform_indices = @transform_2, window_bounds = array<i64: 8, 256>}]} {
    %c0 = arith.constant 0 : index
    %c0_0 = arith.constant 0 : index
    %0 = vector.load %arg1[%c0, %c0_0] : memref<8x256xf32, #tpu.memory_space<vmem>>, vector<8x256xf32>
    %c0_1 = arith.constant 0 : index
    %c0_2 = arith.constant 0 : index
    %1 = vector.load %arg2[%c0_1, %c0_2] : memref<256x256xf32, #tpu.memory_space<vmem>>, vector<256x256xf32>
    %cst = arith.constant dense<0.000000e+00> : vector<8x256xf32>
    %2 = tpu.matmul %0, %1, %cst {dimension_numbers = #tpu.dot_dimension_numbers<[1], [0], [0], [1], [0, 0, 1, 1], [], []>} : vector<8x256xf32>, vector<256x256xf32>, vector<8x256xf32> -> vector<8x256xf32>
    %c0_3 = arith.constant 0 : index
    %c0_4 = arith.constant 0 : index
    %3 = vector.load %arg3[%c0_3, %c0_4] : memref<8x256xf32, #tpu.memory_space<vmem>>, vector<8x256xf32>
    tpu.vector_store %arg3[%c0_3, %c0_4], %2 {strides = array<i32>} : memref<8x256xf32, #tpu.memory_space<vmem>>, vector<8x256xf32>,
    return
  }
  func.func @transform_0(%arg0: i32) -> (i32, i32) {
    %c0_i32 = arith.constant 0 : i32
    %c0_i32_0 = arith.constant 0 : i32
    return %arg0, %c0_i32 : i32, i32
  }
  func.func @transform_1(%arg0: i32) -> (i32, i32) {
    %c0_i32 = arith.constant 0 : i32
    %c0_i32_0 = arith.constant 0 : i32
    %c0_i32_1 = arith.constant 0 : i32
    return %c0_i32, %c0_i32_0 : i32, i32
  }
  func.func @transform_2(%arg0: i32) -> (i32, i32) {
    %c0_i32 = arith.constant 0 : i32
    %c0_i32_0 = arith.constant 0 : i32
    return %arg0, %c0_i32 : i32, i32
  }
}

</mosaic_0001>

<bundles_post_ra>
// kernel: tpu_custom_call.1
= control target key start
LH: loop header
LB: loop body
LE: loop exit
PB: predicated region body
PF: predicated region fallthrough
CT: control target
= control target key end

     0   :  { %7 = vsyncpa [#allocation3], 0  ;;  %s397_s0 = inlined_call_operand.hbm [shape: f32[8,256], index: 0, kind: input, shape index: {}]   ;;  %s398_s1 = inlined_call_operand.hbm [shape: f32[256,256], index: 1, kind: input, shape index: {}]   ;;  %s399_s2 = inlined_call_operand.hbm [shape: f32[8,256], index: 2, kind: output, shape index: {}]  }
   0x1   :  { %8 = vsyncpa [#allocation6], 0 }
   0x2   :  { %9 = vsyncpa [#allocation4], 0  ;;  %s334_s9 = smov [#allocation2]   ;;  %s335_s11 = smov [#allocation5]  }
   0x3   :  { %s16_s10 = sshll.u32 %s334_s9, 4  ;;  %s25_s12 = sshll.u32 %s335_s11, 4  ;;  %s17_s10 = int_to_ptr.vmem [resolvable:$true] %s16_s10  ;;  %s354_s12 = int_to_ptr.vmem [resolvable:$true] %s25_s12 }
   0x4   :  { %s262_s15 = scalar_lea.hbm %s397_s0, 256 }
   0x5   :  { %p263_p0 = scmp.ne.s32.totalorder %s397_s0, %s262_s15  ;;  %p266_p1 = scmp.lt.u32.totalorder %s262_s15, %s397_s0 }
   0x7   :  { %p268_p2 = pnand %p266_p1, %p263_p0 }
   0x9   :  { %271 = shalt.err (!%p268_p2)
}
   0xa   :  { %s272_s20 = scalar_lea.vmem %s17_s10, 256  ;;  %p277_p4 = scmp.lt.s32.totalorder %s17_s10, %s17_s10 }
   0xb   :  { %p273_p3 = scmp.ne.s32.totalorder %s17_s10, %s272_s20  ;;  %p278_p5 = scmp.lt.s32.totalorder %s272_s20, %s272_s20 }
   0xd   :  { %p279_p6 = por %p278_p5, %p277_p4 }
   0xf   :  { %p280_p7 = pnand %p279_p6, %p273_p3 }
  0x11   :  { %283 = shalt.err (!%p280_p7)
}
  0x12   :  { %19 = dma.hbm_to_vmem [thread:$0]  %s397_s0, 256, %s17_s10, [#allocation3]  }
  0x13   :  { %s284_s25 = scalar_lea.hbm %s398_s1, 8192 }
  0x14   :  { %p285_p8 = scmp.ne.s32.totalorder %s398_s1, %s284_s25  ;;  %p288_p9 = scmp.lt.u32.totalorder %s284_s25, %s398_s1 }
  0x16   :  { %p290_p10 = pnand %p288_p9, %p285_p8 }
  0x18   :  { %293 = shalt.err (!%p290_p10)
}
  0x19   :  { %s294_s30 = scalar_lea.vmem %s354_s12, 8192  ;;  %p299_p12 = scmp.lt.s32.totalorder %s354_s12, %s354_s12 }
  0x1a   :  { %p295_p11 = scmp.ne.s32.totalorder %s354_s12, %s294_s30  ;;  %p300_p13 = scmp.lt.s32.totalorder %s294_s30, %s294_s30 }
  0x1c   :  { %p301_p0 = por %p300_p13, %p299_p12 }
  0x1e   :  { %p302_p1 = pnand %p301_p0, %p295_p11 }
  0x20   :  { %305 = shalt.err (!%p302_p1)
}
  0x21   :  { %s336_s0 = smov 256   ;;  %s337_s3 = smov 16  }
  0x22   :  { %31 = dma.hbm_to_vmem [thread:$0]  %s398_s1, 8192, %s354_s12, [#allocation6], %s336_s0, %s336_s0, %s337_s3  }
  0x23   :  { %328 = dma.done.wait [#allocation3], 256  }
  0x24   :  { %329 = vsyncadd [#allocation3], 4294967040 }
  0x25   :  { %330 = dma.done.wait [#allocation6], 8192  }
  0x26   :  { %331 = vsyncadd [#allocation6], 4294959104  ;;  %v41_v0 = vld [vmem:[#allocation5 + $0x8] sm:$0xff]  ;;  %v43_v1 = vld [vmem:[#allocation5 + $0x18] sm:$0xff]  ;;  %s338_s1 = smov [#allocation7]  }
  0x27   :  { %v40_v2 = vld [vmem:[#allocation5] sm:$0xff]  ;;  %v193_v3 = vpack.c.bf16 %v43_v1, %v41_v0  ;;  %v42_v4 = vld [vmem:[#allocation5 + $0x10] sm:$0xff]  ;;  %v45_v5 = vld [vmem:[#allocation5 + $0x28] sm:$0xff]  ;;  %s183_s6 = sshll.u32 %s338_s1, 4  ;;  %s184_s6 = int_to_ptr.vmem [resolvable:$true] %s183_s6 }
  0x28   :  { %v47_v6 = vld [vmem:[#allocation5 + $0x38] sm:$0xff]  ;;  %v195_v7 = vpack.c.bf16 %v42_v4, %v40_v2  ;;  %v44_v9 = vld [vmem:[#allocation5 + $0x20] sm:$0xff]  ;;  %v46_v10 = vld [vmem:[#allocation5 + $0x30] sm:$0xff]  ;;  %s306_s7 = scalar_lea.vmem %s184_s6, 256  ;;  %p311_p3 = scmp.lt.s32.totalorder %s184_s6, %s184_s6 }
  0x29   :  { %v197_v8 = vpack.c.bf16 %v47_v6, %v45_v5  ;;  %v49_v11 = vld [vmem:[#allocation5 + $0x48] sm:$0xff]  ;;  %194 = vmatprep.subr.bf16.mxu0 %v193_v3  ;;  %v51_v12 = vld [vmem:[#allocation5 + $0x58] sm:$0xff]  ;;  %v199_v13 = vpack.c.bf16 %v46_v10, %v44_v9  ;;  %v48_v15 = vld [vmem:[#allocation5 + $0x40] sm:$0xff]  ;;  %p307_p2 = scmp.ne.s32.totalorder %s184_s6, %s306_s7  ;;  %p312_p4 = scmp.lt.s32.totalorder %s306_s7, %s306_s7 }
  0x2a   :  { %196 = vmatpush1.bf16.msra.mxu0 %v195_v7  ;;  %v201_v14 = vpack.c.bf16 %v51_v12, %v49_v11  ;;  %v50_v16 = vld [vmem:[#allocation5 + $0x50] sm:$0xff]  ;;  %v53_v17 = vld [vmem:[#allocation5 + $0x68] sm:$0xff]  ;;  %v55_v18 = vld [vmem:[#allocation5 + $0x78] sm:$0xff] }
  0x2b   :  { %198 = vmatprep.subr.bf16.mxu0 %v197_v8  ;;  %v203_v19 = vpack.c.bf16 %v50_v16, %v48_v15  ;;  %v205_v20 = vpack.c.bf16 %v55_v18, %v53_v17  ;;  %v52_v21 = vld [vmem:[#allocation5 + $0x60] sm:$0xff]  ;;  %v54_v22 = vld [vmem:[#allocation5 + $0x70] sm:$0xff]  ;;  %v57_v23 = vld [vmem:[#allocation5 + $0x88] sm:$0xff]  ;;  %p313_p5 = por %p312_p4, %p311_p3 }
  0x2c   :  { %v59_v24 = vld [vmem:[#allocation5 + $0x98] sm:$0xff]  ;;  %v207_v25 = vpack.c.bf16 %v54_v22, %v52_v21  ;;  %v56_v27 = vld [vmem:[#allocation5 + $0x80] sm:$0xff]  ;;  %v58_v28 = vld [vmem:[#allocation5 + $0x90] sm:$0xff] }
  0x2d   :  { %v209_v26 = vpack.c.bf16 %v59_v24, %v57_v23  ;;  %v61_v29 = vld [vmem:[#allocation5 + $0xa8] sm:$0xff]  ;;  %v63_v30 = vld [vmem:[#allocation5 + $0xb8] sm:$0xff]  ;;  %v211_v31 = vpack.c.bf16 %v58_v28, %v56_v27  ;;  %v60_v33 = vld [vmem:[#allocation5 + $0xa0] sm:$0xff]  ;;  %p314_p6 = pnand %p313_p5, %p307_p2 }
  0x2e   :  { %200 = vmatpush1.bf16.msra.mxu0 %v199_v13  ;;  %v213_v32 = vpack.c.bf16 %v63_v30, %v61_v29  ;;  %v62_v34 = vld [vmem:[#allocation5 + $0xb0] sm:$0xff]  ;;  %v65_v35 = vld [vmem:[#allocation5 + $0xc8] sm:$0xff]  ;;  %v67_v36 = vld [vmem:[#allocation5 + $0xd8] sm:$0xff] }
  0x2f   :  { %202 = vmatprep.subr.bf16.mxu0 %v201_v14  ;;  %v215_v37 = vpack.c.bf16 %v62_v34, %v60_v33  ;;  %v217_v38 = vpack.c.bf16 %v67_v36, %v65_v35  ;;  %v64_v39 = vld [vmem:[#allocation5 + $0xc0] sm:$0xff]  ;;  %v66_v40 = vld [vmem:[#allocation5 + $0xd0] sm:$0xff]  ;;  %v39_v41 = vld [vmem:[#allocation2 + $0x8] sm:$0xff] }
  0x30   :  { %v69_v42 = vld [vmem:[#allocation5 + $0xe8] sm:$0xff]  ;;  %v71_v43 = vld [vmem:[#allocation5 + $0xf8] sm:$0xff]  ;;  %168 = vmatprep.mubr.f32.mxu0 %v39_v41  ;;  %v219_v44 = vpack.c.bf16 %v66_v40, %v64_v39  ;;  %v68_v46 = vld [vmem:[#allocation5 + $0xe0] sm:$0xff] }
  0x31   :  { %v221_v45 = vpack.c.bf16 %v71_v43, %v69_v42  ;;  %v70_v47 = vld [vmem:[#allocation5 + $0xf0] sm:$0xff]  ;;  %v73_v48 = vld [vmem:[#allocation5 + $0x108] sm:$0xff]  ;;  %v75_v49 = vld [vmem:[#allocation5 + $0x118] sm:$0xff] }
  0x32   :  { %204 = vmatpush1.bf16.msra.mxu0 %v203_v19  ;;  %v223_v50 = vpack.c.bf16 %v70_v47, %v68_v46  ;;  %v225_v51 = vpack.c.bf16 %v75_v49, %v73_v48  ;;  %v72_v52 = vld [vmem:[#allocation5 + $0x100] sm:$0xff]  ;;  %v74_v53 = vld [vmem:[#allocation5 + $0x110] sm:$0xff]  ;;  %v77_v54 = vld [vmem:[#allocation5 + $0x128] sm:$0xff] }
  0x33   :  { %206 = vmatprep.subr.bf16.mxu0 %v205_v20  ;;  %v79_v55 = vld [vmem:[#allocation5 + $0x138] sm:$0xff]  ;;  %v227_v56 = vpack.c.bf16 %v74_v53, %v72_v52  ;;  %v76_v58 = vld [vmem:[#allocation5 + $0x120] sm:$0xff]  ;;  %v78_v59 = vld [vmem:[#allocation5 + $0x130] sm:$0xff] }
  0x34   :  { %v229_v57 = vpack.c.bf16 %v79_v55, %v77_v54  ;;  %v81_v60 = vld [vmem:[#allocation5 + $0x148] sm:$0xff]  ;;  %v83_v61 = vld [vmem:[#allocation5 + $0x158] sm:$0xff]  ;;  %v231_v62 = vpack.c.bf16 %v78_v59, %v76_v58  ;;  %v80_v0 = vld [vmem:[#allocation5 + $0x140] sm:$0xff] }
  0x35   :  { %v233_v63 = vpack.c.bf16 %v83_v61, %v81_v60  ;;  %v82_v1 = vld [vmem:[#allocation5 + $0x150] sm:$0xff]  ;;  %v85_v2 = vld [vmem:[#allocation5 + $0x168] sm:$0xff]  ;;  %v87_v3 = vld [vmem:[#allocation5 + $0x178] sm:$0xff] }
  0x36   :  { %208 = vmatpush1.bf16.msra.mxu0 %v207_v25  ;;  %v235_v4 = vpack.c.bf16 %v82_v1, %v80_v0  ;;  %v237_v5 = vpack.c.bf16 %v87_v3, %v85_v2  ;;  %v84_v6 = vld [vmem:[#allocation5 + $0x160] sm:$0xff]  ;;  %v86_v7 = vld [vmem:[#allocation5 + $0x170] sm:$0xff]  ;;  %v89_v8 = vld [vmem:[#allocation5 + $0x188] sm:$0xff] }
  0x37   :  { %210 = vmatprep.subr.bf16.mxu0 %v209_v26  ;;  %v91_v9 = vld [vmem:[#allocation5 + $0x198] sm:$0xff]  ;;  %v239_v10 = vpack.c.bf16 %v86_v7, %v84_v6  ;;  %v88_v12 = vld [vmem:[#allocation5 + $0x180] sm:$0xff]  ;;  %v90_v13 = vld [vmem:[#allocation5 + $0x190] sm:$0xff] }
  0x38   :  { %v241_v11 = vpack.c.bf16 %v91_v9, %v89_v8  ;;  %v93_v14 = vld [vmem:[#allocation5 + $0x1a8] sm:$0xff]  ;;  %v95_v15 = vld [vmem:[#allocation5 + $0x1b8] sm:$0xff]  ;;  %v243_v16 = vpack.c.bf16 %v90_v13, %v88_v12  ;;  %v92_v18 = vld [vmem:[#allocation5 + $0x1a0] sm:$0xff] }
  0x39   :  { %v245_v17 = vpack.c.bf16 %v95_v15, %v93_v14  ;;  %v94_v19 = vld [vmem:[#allocation5 + $0x1b0] sm:$0xff]  ;;  %v97_v20 = vld [vmem:[#allocation5 + $0x1c8] sm:$0xff]  ;;  %v99_v21 = vld [vmem:[#allocation5 + $0x1d8] sm:$0xff] }
  0x3a   :  { %212 = vmatpush1.bf16.msra.mxu0 %v211_v31  ;;  %v247_v22 = vpack.c.bf16 %v94_v19, %v92_v18  ;;  %v249_v23 = vpack.c.bf16 %v99_v21, %v97_v20  ;;  %v96_v24 = vld [vmem:[#allocation5 + $0x1c0] sm:$0xff]  ;;  %v98_v25 = vld [vmem:[#allocation5 + $0x1d0] sm:$0xff]  ;;  %v101_v26 = vld [vmem:[#allocation5 + $0x1e8] sm:$0xff] }
  0x3b   :  { %214 = vmatprep.subr.bf16.mxu0 %v213_v32  ;;  %v103_v27 = vld [vmem:[#allocation5 + $0x1f8] sm:$0xff]  ;;  %v251_v28 = vpack.c.bf16 %v98_v25, %v96_v24  ;;  %v100_v30 = vld [vmem:[#allocation5 + $0x1e0] sm:$0xff]  ;;  %v102_v31 = vld [vmem:[#allocation5 + $0x1f0] sm:$0xff] }
  0x3c   :  { %v253_v29 = vpack.c.bf16 %v103_v27, %v101_v26  ;;  %v255_v32 = vpack.c.bf16 %v102_v31, %v100_v30  ;;  %v38_v33 = vld [vmem:[#allocation2] sm:$0xff] }
  0x3e   :  { %216 = vmatpush1.bf16.msra.mxu0 %v215_v37 }
  0x3f   :  { %218 = vmatprep.subr.bf16.mxu0 %v217_v38 }
  0x42   :  { %220 = vmatpush1.bf16.msra.mxu0 %v219_v44 }
  0x43   :  { %222 = vmatprep.subr.bf16.mxu0 %v221_v45 }
  0x46   :  { %224 = vmatpush1.bf16.msra.mxu0 %v223_v50 }
  0x47   :  { %226 = vmatprep.subr.bf16.mxu0 %v225_v51 }
  0x4a   :  { %228 = vmatpush1.bf16.msra.mxu0 %v227_v56 }
  0x4b   :  { %230 = vmatprep.subr.bf16.mxu0 %v229_v57 }
  0x4e   :  { %232 = vmatpush1.bf16.msra.mxu0 %v231_v62 }
  0x4f   :  { %234 = vmatprep.subr.bf16.mxu0 %v233_v63 }
  0x52   :  { %236 = vmatpush1.bf16.msra.mxu0 %v235_v4 }
  0x53   :  { %238 = vmatprep.subr.bf16.mxu0 %v237_v5 }
  0x56   :  { %240 = vmatpush1.bf16.msra.mxu0 %v239_v10 }
  0x57   :  { %242 = vmatprep.subr.bf16.mxu0 %v241_v11 }
  0x5a   :  { %244 = vmatpush1.bf16.msra.mxu0 %v243_v16 }
  0x5b   :  { %246 = vmatprep.subr.bf16.mxu0 %v245_v17 }
  0x5e   :  { %248 = vmatpush1.bf16.msra.mxu0 %v247_v22 }
  0x5f   :  { %250 = vmatprep.subr.bf16.mxu0 %v249_v23 }
  0x62   :  { %252 = vmatpush1.bf16.msra.mxu0 %v251_v28 }
  0x63   :  { %254 = vmatprep.subr.bf16.mxu0 %v253_v29 }
  0x66   :  { %256 = vmatpush1.bf16.msra.mxu0 %v255_v32 }
  0x69   :  { %169 = vmatmul.mubr.f32.vlgmr.msra.gmra.mrb[0].mxu0 %v38_v33 }
 0x13c   :  { %v170_v34 = vpop.f32.mrb[0].mxu0 }
 0x13d   :  { %175 = vst [vmem:[#allocation7] sm:$0xff] %v170_v34  ;;  %v172_v35 = vpop.f32.mrb[1].mxu0 }
 0x13e   :  { %176 = vst [vmem:[#allocation7 + $0x8] sm:$0xff] %v172_v35 }
 0x13f   :  { %317 = shalt.err (!%p314_p6)
}
 0x140   :  { %s318_s10 = scalar_lea.hbm %s399_s2, 256 }
 0x141   :  { %p319_p7 = scmp.ne.s32.totalorder %s399_s2, %s318_s10  ;;  %p322_p8 = scmp.lt.u32.totalorder %s318_s10, %s399_s2 }
 0x143   :  { %p324_p9 = pnand %p322_p8, %p319_p7 }
 0x145   :  { %327 = shalt.err (!%p324_p9)
}
 0x146   :  { %186 = dma.vmem_to_hbm [thread:$0]  %s184_s6, 256, %s399_s2, [#allocation4]  }
 0x147   :  { %332 = dma.done.wait [#allocation4], 256  }
 0x148   :  { %333 = vsyncadd [#allocation4], 4294967040 }
 0x149   :  { %190 = vsyncpa [#allocation3], 1 }
 0x14a   :  { %191 = vsyncpa [#allocation6], 1 }
 0x14b   :  { %192 = vsyncpa [#allocation4], 1 }

</bundles_post_ra>
